<compile_context>
chip_gen: v7x
topology: tpu7x:2x2x1
jax: 0.10.0
libtpu: 0.0.40
codegen_flags: <defaults>
</compile_context>

<pallas_src>
import functools

import jax
import jax.numpy as jnp
from jax.experimental import pallas as pl
from jax.experimental.pallas import tpu as pltpu


def _round_up(x, m):
    return ((x + m - 1) // m) * m


def _gru_fused_kernel(x_ref, w_ref, b_ref, out_ref, *, h):
    # In-kernel bf16 cast (no separate XLA pass over x in HBM); MXU accumulates f32.
    x = x_ref[...].astype(jnp.bfloat16)
    # One MXU push per tile: z = x @ [Wu | Wc | Wg] + [bu | bc | bg]
    z = jnp.dot(x, w_ref[...], preferred_element_type=jnp.float32) + b_ref[...]
    # sigmoid(a) == 0.5*(1 + tanh(a/2)): one EUP transcendental instead of exp+divide.
    u = 0.5 * (1.0 + jnp.tanh(0.5 * z[:, :h]))
    c = jnp.tanh(z[:, h:2 * h])
    ng = z[:, 2 * h:]
    # state == 0 every step  =>  new_h = u*state + (1-u)*c*new_gate = (1-u)*c*new_gate
    out_ref[...] = ((1.0 - u) * c * ng).astype(out_ref.dtype)


def init_params(key, input_size, hidden_size):
    """Deterministic init mirroring torch.nn.Linear default (U(-1/sqrt(fan_in), ..))."""
    emb = input_size // 2

    def linear(k, in_f, out_f):
        k1, k2 = jax.random.split(k)
        bound = 1.0 / (in_f ** 0.5)
        # stored transposed: (in_features, out_features) so math is x @ W + b
        w = jax.random.uniform(k1, (in_f, out_f), jnp.float32, -bound, bound)
        b = jax.random.uniform(k2, (1, out_f), jnp.float32, -bound, bound)
        return w, b

    keys = jax.random.split(key, 6)
    wr, br = linear(keys[0], emb + hidden_size, hidden_size)   # reset_linear (dead: state==0)
    wu, bu = linear(keys[1], emb + hidden_size, hidden_size)   # update_linear
    wc, bc = linear(keys[2], emb + hidden_size, hidden_size)   # candidate_linear
    w1, b1 = linear(keys[3], emb, hidden_size)                 # layer1
    w2, b2 = linear(keys[4], emb, hidden_size)                 # layer2
    wng, bng = linear(keys[5], 2 * hidden_size, hidden_size)   # new_gate
    # TODO(synk): ModifiedGRUCell also defines new_r_gate and a ReLU that are never
    # used in forward(); they are intentionally not instantiated here.
    return dict(
        wr_x=wr[:emb], wr_h=wr[emb:], br=br,   # kept for module parity; never used (state==0)
        wu_x=wu[:emb], wu_h=wu[emb:], bu=bu,   # wu_h dead (state==0)
        wc_x=wc[:emb], wc_h=wc[emb:], bc=bc,   # wc_h dead (r*state==0)
        w1=w1, b1=b1, w2=w2, b2=b2,
        wng_s=wng[:hidden_size], wng_n=wng[hidden_size:], bng=bng,
    )


def _fuse_params(params, emb, hidden_size):
    """Fold layer1/layer2 into new_gate, drop dead state terms, pack one (D, 3*H) weight.

    Column blocks (H-granular, no per-gate lane padding): [update | candidate | new_gate].
    Row blocks: rows [0:emb] multiply x[:, :emb] ("inputs"),
                rows [emb:2emb] multiply x[:, emb:] ("neighbors").
    """
    f32 = jnp.float32
    H = hidden_size
    w1p = params['w1'] @ params['wng_s']                                   # (emb, H)
    w2p = params['w2'] @ params['wng_n']                                   # (emb, H)
    bgp = params['b1'] @ params['wng_s'] + params['b2'] @ params['wng_n'] + params['bng']

    zeros = jnp.zeros((emb, H), f32)
    w_u = jnp.concatenate([params['wu_x'].astype(f32), zeros], axis=0)     # (D, H)
    w_c = jnp.concatenate([params['wc_x'].astype(f32), zeros], axis=0)     # (D, H)
    w_g = jnp.concatenate([w1p.astype(f32), w2p.astype(f32)], axis=0)      # (D, H)
    w_fused = jnp.concatenate([w_u, w_c, w_g], axis=1).astype(jnp.bfloat16)   # (D, 3H)
    b_fused = jnp.concatenate(
        [params['bu'], params['bc'], bgp], axis=1).astype(f32)             # (1, 3H)
    return w_fused, b_fused


def _resident_spec(shape):
    """VMEM-resident operand (constant index_map); single-buffered to save VMEM."""
    idx_map = lambda i, _n=len(shape): (0,) * _n
    try:
        return pl.BlockSpec(shape, idx_map, pipeline_mode=pl.Buffered(1))
    except (TypeError, AttributeError):   # older jax without pipeline_mode
        return pl.BlockSpec(shape, idx_map)


def naive_gru_forward(x, params, hidden_size, *, tm_max=512, out_dtype=jnp.bfloat16):
    """x: (B, L, input_size) float32. Returns (outputs (B, L, H), state (B, H))."""
    B, L, D = x.shape
    assert D % 2 == 0, "input_size must be even (embedding_size = input_size / 2)"
    emb = D // 2
    H = hidden_size
    M = B * L

    w_fused, b_fused = _fuse_params(params, emb, H)

    # Row tile: multiple of 16 (bf16 sublane tile); aim for >=2 grid steps so the
    # "parallel" M axis shards across both TensorCores on v7x; cap at 512 so the
    # double-buffered x/out tiles fit v7x's 64 MiB VMEM (and v5e's raised limit).
    tm = max(16, min(tm_max, _round_up((M + 1) // 2, 16)))
    grid = pl.cdiv(M, tm)   # ragged last block: OOB reads ignored, OOB writes dropped

    xf = x.reshape(M, D)    # free: row-major metadata reshape, no copy

    kernel = functools.partial(_gru_fused_kernel, h=H)
    out = pl.pallas_call(
        kernel,
        out_shape=jax.ShapeDtypeStruct((M, H), out_dtype),
        grid_spec=pltpu.PrefetchScalarGridSpec(
            num_scalar_prefetch=0,
            grid=(grid,),
            in_specs=[
                pl.BlockSpec((tm, D), lambda i: (i, 0)),   # x rows, tiled over M
                _resident_spec((D, 3 * H)),                # fused weight (resident)
                _resident_spec((1, 3 * H)),                # fused bias   (resident)
            ],
            out_specs=pl.BlockSpec((tm, H), lambda i: (i, 0)),
        ),
        compiler_params=pltpu.CompilerParams(
            dimension_semantics=("parallel",),        # shard M across TCs on v7x
            vmem_limit_bytes=48 * 1024 * 1024,        # v5e default (16 MiB) is too low
        ),
    )(xf, w_fused, b_fused)

    outputs = out.reshape(B, L, H)       # free: splits the leading dim only
    final_state = outputs[:, -1, :]      # state after the loop == last step's new_h
    return outputs, final_state


if __name__ == "__main__":
    B, L, INPUT_SIZE, HIDDEN = 2, 8, 16, 32
    key = jax.random.PRNGKey(0)
    kx, kp = jax.random.split(key)
    x = jax.random.normal(kx, (B, L, INPUT_SIZE), jnp.float32)
    params = init_params(kp, INPUT_SIZE, HIDDEN)

    outputs, state = naive_gru_forward(x, params, HIDDEN)
    jax.block_until_ready((outputs, state))

    assert outputs.shape == (B, L, HIDDEN)
    assert state.shape == (B, HIDDEN)
    assert bool(jnp.all(jnp.isfinite(outputs.astype(jnp.float32))))
    print("KERNEL_OK")
</pallas_src>

<mosaic_0001>
module attributes {stable_mosaic.version = 11 : i64} {
  func.func @_gru_fused_kernel(%arg0: i32, %arg1: memref<16x16xf32, #tpu.memory_space<vmem>>, %arg2: memref<16x96xbf16, #tpu.memory_space<vmem>>, %arg3: memref<1x96xf32, #tpu.memory_space<vmem>>, %arg4: memref<16x32xbf16, #tpu.memory_space<vmem>>) attributes {dimension_semantics = [#tpu.dimension_semantics<parallel>], iteration_bounds = array<i64: 1>, scalar_prefetch = 0 : i64, scratch_operands = 0 : i64, tpu.core_type = #tpu.core_type<tc>, window_params = [{transform_indices = @transform_0, window_bounds = array<i64: 16, 16>}, {pipeline_mode = #tpu.pipeline_mode<synchronous>, transform_indices = @transform_1, window_bounds = array<i64: 16, 96>}, {pipeline_mode = #tpu.pipeline_mode<synchronous>, transform_indices = @transform_2, window_bounds = array<i64: 1, 96>}, {transform_indices = @transform_3, window_bounds = array<i64: 16, 32>}]} {
    %c0 = arith.constant 0 : index
    %c0_0 = arith.constant 0 : index
    %0 = vector.load %arg1[%c0, %c0_0] : memref<16x16xf32, #tpu.memory_space<vmem>>, vector<16x16xf32>
    %1 = arith.truncf %0 : vector<16x16xf32> to vector<16x16xbf16>
    %c0_1 = arith.constant 0 : index
    %c0_2 = arith.constant 0 : index
    %2 = vector.load %arg2[%c0_1, %c0_2] : memref<16x96xbf16, #tpu.memory_space<vmem>>, vector<16x96xbf16>
    %cst = arith.constant dense<0.000000e+00> : vector<16x96xf32>
    %3 = tpu.matmul %1, %2, %cst {dimension_numbers = #tpu.dot_dimension_numbers<[1], [0], [0], [1], [0, 0, 1, 1], [], []>} : vector<16x16xbf16>, vector<16x96xbf16>, vector<16x96xf32> -> vector<16x96xf32>
    %c0_3 = arith.constant 0 : index
    %c0_4 = arith.constant 0 : index
    %4 = vector.load %arg3[%c0_3, %c0_4] : memref<1x96xf32, #tpu.memory_space<vmem>>, vector<1x96xf32>
    %5 = vector.broadcast %4 : vector<1x96xf32> to vector<16x96xf32>
    %6 = arith.addf %3, %5 : vector<16x96xf32>
    %7 = vector.extract_strided_slice %6 {offsets = [0, 0], sizes = [16, 32], strides = [1, 1]} : vector<16x96xf32> to vector<16x32xf32>
    %cst_5 = arith.constant 5.000000e-01 : f32
    %8 = vector.broadcast %cst_5 : f32 to vector<16x32xf32>
    %9 = arith.mulf %8, %7 : vector<16x32xf32>
    %10 = math.tanh %9 : vector<16x32xf32>
    %cst_6 = arith.constant 1.000000e+00 : f32
    %11 = vector.broadcast %cst_6 : f32 to vector<16x32xf32>
    %12 = arith.addf %11, %10 : vector<16x32xf32>
    %cst_7 = arith.constant 5.000000e-01 : f32
    %13 = vector.broadcast %cst_7 : f32 to vector<16x32xf32>
    %14 = arith.mulf %13, %12 : vector<16x32xf32>
    %15 = vector.extract_strided_slice %6 {offsets = [0, 32], sizes = [16, 32], strides = [1, 1]} : vector<16x96xf32> to vector<16x32xf32>
    %16 = math.tanh %15 : vector<16x32xf32>
    %17 = vector.extract_strided_slice %6 {offsets = [0, 64], sizes = [16, 32], strides = [1, 1]} : vector<16x96xf32> to vector<16x32xf32>
    %cst_8 = arith.constant 1.000000e+00 : f32
    %18 = vector.broadcast %cst_8 : f32 to vector<16x32xf32>
    %19 = arith.subf %18, %14 : vector<16x32xf32>
    %20 = arith.mulf %19, %16 : vector<16x32xf32>
    %21 = arith.mulf %20, %17 : vector<16x32xf32>
    %22 = arith.truncf %21 : vector<16x32xf32> to vector<16x32xbf16>
    %c0_9 = arith.constant 0 : index
    %c0_10 = arith.constant 0 : index
    %23 = vector.load %arg4[%c0_9, %c0_10] : memref<16x32xbf16, #tpu.memory_space<vmem>>, vector<16x32xbf16>
    tpu.vector_store %arg4[%c0_9, %c0_10], %22 {strides = array<i32>} : memref<16x32xbf16, #tpu.memory_space<vmem>>, vector<16x32xbf16>,
    return
  }
  func.func @transform_0(%arg0: i32) -> (i32, i32) {
    %c0_i32 = arith.constant 0 : i32
    %c0_i32_0 = arith.constant 0 : i32
    return %arg0, %c0_i32 : i32, i32
  }
  func.func @transform_1(%arg0: i32) -> (i32, i32) {
    %c0_i32 = arith.constant 0 : i32
    %c0_i32_0 = arith.constant 0 : i32
    %c0_i32_1 = arith.constant 0 : i32
    return %c0_i32, %c0_i32_0 : i32, i32
  }
  func.func @transform_2(%arg0: i32) -> (i32, i32) {
    %c0_i32 = arith.constant 0 : i32
    %c0_i32_0 = arith.constant 0 : i32
    %c0_i32_1 = arith.constant 0 : i32
    return %c0_i32, %c0_i32_0 : i32, i32
  }
  func.func @transform_3(%arg0: i32) -> (i32, i32) {
    %c0_i32 = arith.constant 0 : i32
    %c0_i32_0 = arith.constant 0 : i32
    return %arg0, %c0_i32 : i32, i32
  }
}

</mosaic_0001>

<bundles_post_ra>
// kernel: tpu_custom_call.1
= control target key start
LH: loop header
LB: loop body
LE: loop exit
PB: predicated region body
PF: predicated region fallthrough
CT: control target
= control target key end

     0   :  { %8 = vsyncpa [#allocation3], 0  ;;  %s351_s0 = inlined_call_operand.hbm [shape: f32[16,16], index: 0, kind: input, shape index: {}]   ;;  %s352_s1 = inlined_call_operand.hbm [shape: bf16[16,96], index: 1, kind: input, shape index: {}]   ;;  %s353_s2 = inlined_call_operand.vmem [shape: f32[1,96], index: 2, kind: input, shape index: {}]   ;;  %s354_s3 = inlined_call_operand.hbm [shape: bf16[16,32], index: 3, kind: output, shape index: {}]  }
   0x1   :  { %9 = vsyncpa [#allocation6], 0 }
   0x2   :  { %10 = vsyncpa [#allocation4], 0  ;;  %s274_s12 = smov [#allocation2]   ;;  %s202_s16 = scalar_lea.hbm %s351_s0, 256 }
   0x3   :  { %s16_s13 = sshll.u32 %s274_s12, 4  ;;  %p203_p0 = scmp.ne.s32.totalorder %s351_s0, %s202_s16  ;;  %s17_s13 = int_to_ptr.vmem [resolvable:$true] %s16_s13 }
   0x4   :  { %p206_p1 = scmp.lt.u32.totalorder %s202_s16, %s351_s0 }
   0x6   :  { %p208_p2 = pnand %p206_p1, %p203_p0 }
   0x8   :  { %211 = shalt.err (!%p208_p2)
}
   0x9   :  { %s212_s21 = scalar_lea.vmem %s17_s13, 256  ;;  %p217_p4 = scmp.lt.s32.totalorder %s17_s13, %s17_s13 }
   0xa   :  { %p213_p3 = scmp.ne.s32.totalorder %s17_s13, %s212_s21  ;;  %p218_p5 = scmp.lt.s32.totalorder %s212_s21, %s212_s21 }
   0xc   :  { %p219_p6 = por %p218_p5, %p217_p4 }
   0xe   :  { %p220_p7 = pnand %p219_p6, %p213_p3 }
  0x10   :  { %223 = shalt.err (!%p220_p7)
}
  0x11   :  { %s275_s22 = smov 128   ;;  %s276_s23 = smov 8  }
  0x12   :  { %22 = dma.hbm_to_vmem [thread:$0]  %s351_s0, 256, %s17_s13, [#allocation3], %s275_s22, %s275_s22, %s276_s23  }
  0x13   :  { %s277_s26 = smov [#allocation5]   ;;  %s224_s30 = scalar_lea.hbm %s352_s1, 128 }
  0x14   :  { %s28_s27 = sshll.u32 %s277_s26, 4  ;;  %p225_p8 = scmp.ne.s32.totalorder %s352_s1, %s224_s30  ;;  %s29_s27 = int_to_ptr.vmem [resolvable:$true] %s28_s27 }
  0x15   :  { %p228_p9 = scmp.lt.u32.totalorder %s224_s30, %s352_s1 }
  0x17   :  { %p230_p10 = pnand %p228_p9, %p225_p8 }
  0x19   :  { %233 = shalt.err (!%p230_p10)
}
  0x1a   :  { %s234_s8 = scalar_lea.vmem %s29_s27, 128  ;;  %p239_p12 = scmp.lt.s32.totalorder %s29_s27, %s29_s27 }
  0x1b   :  { %p235_p11 = scmp.ne.s32.totalorder %s29_s27, %s234_s8  ;;  %p240_p13 = scmp.lt.s32.totalorder %s234_s8, %s234_s8 }
  0x1d   :  { %p241_p0 = por %p240_p13, %p239_p12 }
  0x1f   :  { %p242_p1 = pnand %p241_p0, %p235_p11 }
  0x21   :  { %245 = shalt.err (!%p242_p1)
}
  0x22   :  { %s278_s0 = smov 64   ;;  %s279_s9 = smov 4  }
  0x23   :  { %34 = dma.hbm_to_vmem [thread:$0]  %s352_s1, 128, %s29_s27, [#allocation6], %s278_s0, %s278_s0, %s279_s9  }
  0x24   :  { %268 = dma.done.wait [#allocation3], 256  }
  0x25   :  { %269 = vsyncadd [#allocation3], 4294967040 }
  0x26   :  { %270 = dma.done.wait [#allocation6], 128  }
  0x27   :  { %271 = vsyncadd [#allocation6], 4294967168  ;;  %v280_v0 = vmov 0.0   ;;  %vm281_vm0 = vmmov 0   ;;  %v193_v1 = vld [vmem:[#allocation5] sm:$0xff]   ;;  %v44_v2 = vld [vmem:[#allocation2] sm:$0xff] }
  0x28   :  { %177 = vmatprep.subr.bf16.mxu0 %v280_v0  ;;  %179 = vmatprep.mubr.msk.bf16.mxu0 %vm281_vm0, %v280_v0  ;;  %v45_v3 = vld [vmem:[#allocation2 + $0x8] sm:$0xff]  ;;  %vm62_vm1 = vcmask 130048   ;;  %v168_v5 = vld [vmem:[%s353_s2] ss:$0 sm:$0xff]  ;;  %s282_s1 = smov 96   ;;  %vm147_vm2 = vcmask 257024  }
  0x29   :  { %178 = vmatpush3.bf16.msra.mxu0 %v193_v1  ;;  %v46_v4 = vpack.c.bf16 %v45_v3, %v44_v2  ;;  %s283_s2 = smov [#allocation7]  }
  0x2a   :  { %s155_s14 = sshll.u32 %s283_s2, 4  ;;  %s156_s14 = int_to_ptr.vmem [resolvable:$true] %s155_s14 }
  0x2b   :  { %s246_s15 = scalar_lea.vmem %s156_s14, 128  ;;  %p251_p3 = scmp.lt.s32.totalorder %s156_s14, %s156_s14 }
  0x2c   :  { %180 = vmatmul.mubr.msk.bf16.vlgmr.msra.gmra.mrb[0].mxu0 %vm62_vm1, %v46_v4  ;;  %p247_p2 = scmp.ne.s32.totalorder %s156_s14, %s246_s15  ;;  %p252_p4 = scmp.lt.s32.totalorder %s246_s15, %s246_s15 }
  0x2e   :  { %p253_p5 = por %p252_p4, %p251_p3 }
  0x30   :  { %p254_p6 = pnand %p253_p5, %p247_p2 }
  0xff   :  { %v100_v6 = vpop.f32.mrb[0].mxu0 }
 0x100   :  { %v101_v7 = vadd.f32 %v168_v5, %v100_v6  ;;  %v181_v8 = vpop.f32.mrb[1].mxu0 }
 0x101   :  { %v103_v9 = vpop.f32.mrb[2].mxu0 }
 0x102   :  { %194 = vtanh.f32 %v101_v7  ;;  %v104_v10 = vadd.f32 %v168_v5, %v103_v9  ;;  %131 = vrot.lane.b32.xlu1 %v101_v7, %s278_s0  ;;  %v182_v11 = vpop.f32.mrb[3].mxu0  ;;  %v107_v14 = vmul.f32 0.5, %v101_v7 }
 0x104   :  { %196 = vtanh.f32 %v104_v10  ;;  %v108_v15 = vmul.f32 0.5, %v104_v10 }
 0x105   :  { %198 = vtanh.f32 %v107_v14 }
 0x106   :  { %133 = vrot.lane.b32.xlu1 %v104_v10, %s278_s0  ;;  %200 = vtanh.f32 %v108_v15 }
 0x10c   :  { %v195_v12 = vpop.eup %194 }
 0x10d   :  { %121 = vrot.lane.b32.xlu0 %v195_v12, %s282_s1 }
 0x10e   :  { %v197_v13 = vpop.eup %196 }
 0x10f   :  { %v199_v16 = vpop.eup %198 }
 0x110   :  { %v111_v17 = vadd.f32 1.0, %v199_v16  ;;  %v201_v18 = vpop.eup %200 }
 0x111   :  { %123 = vrot.lane.b32.xlu0 %v197_v13, %s282_s1  ;;  %v112_v20 = vadd.f32 1.0, %v201_v18 }
 0x112   :  { %v113_v19 = vmul.f32 0.5, %v111_v17 }
 0x113   :  { %v114_v22 = vmul.f32 0.5, %v112_v20 }
 0x114   :  { %v117_v21 = vsub.f32 1.0, %v113_v19 }
 0x115   :  { %v118_v27 = vsub.f32 1.0, %v114_v22 }
 0x174   :  { %v132_v23 = vpop.permute.xlu1 %131 }
 0x178   :  { %v134_v31 = vpop.permute.xlu1 %133 }
 0x17f   :  { %v122_v24 = vpop.permute.xlu0 %121 }
 0x180   :  { %v127_v25 = vmul.f32 %v122_v24, %v117_v21 }
 0x182   :  { %v137_v26 = vmul.f32 %v132_v23, %v127_v25 }
 0x183   :  { %v124_v28 = vpop.permute.xlu0 %123 }
 0x184   :  { %v173_v29 = vpack.c.bf16 %v137_v26, %v137_v26  ;;  %v128_v30 = vmul.f32 %v124_v28, %v118_v27 }
 0x186   :  { %v138_v32 = vmul.f32 %v134_v31, %v128_v30  ;;  %148 = vst.msk [vmem:[#allocation7] sm:$0xf] %vm147_vm2, %v173_v29 }
 0x188   :  { %v174_v33 = vpack.c.bf16 %v138_v32, %v138_v32 }
 0x18a   :  { %149 = vst.msk [vmem:[#allocation7 + $0x4] sm:$0xf] %vm147_vm2, %v174_v33 }
 0x18b   :  { %257 = shalt.err (!%p254_p6)
}
 0x18c   :  { %s258_s18 = scalar_lea.hbm %s354_s3, 128 }
 0x18d   :  { %p259_p7 = scmp.ne.s32.totalorder %s354_s3, %s258_s18  ;;  %p262_p8 = scmp.lt.u32.totalorder %s258_s18, %s354_s3 }
 0x18f   :  { %p264_p9 = pnand %p262_p8, %p259_p7 }
 0x191   :  { %267 = shalt.err (!%p264_p9)
}
 0x192   :  { %161 = dma.vmem_to_hbm [thread:$0]  %s156_s14, 128, %s354_s3, [#allocation4], %s278_s0, %s278_s0, %s279_s9  }
 0x193   :  { %272 = dma.done.wait [#allocation4], 128  }
 0x194   :  { %273 = vsyncadd [#allocation4], 4294967168 }
 0x195   :  { %165 = vsyncpa [#allocation3], 1 }
 0x196   :  { %166 = vsyncpa [#allocation6], 1 }
 0x197   :  { %167 = vsyncpa [#allocation4], 1 }

</bundles_post_ra>
